<compile_context>
chip_gen: v6e
topology: v6e:2x2x1
jax: 0.10.0
libtpu: 0.0.40
codegen_flags: <defaults>
</compile_context>

<pallas_src>
import jax
import jax.numpy as jnp
from jax.experimental import pallas as pl
from jax.experimental.pallas import tpu as pltpu

DIM, HIDDEN, LATENT = 32, 16, 8


# ----------------------------------------------------------------------------
# Fused Pallas kernel: whole encoder+decoder forward on one batch tile.
# HBM layout is batch-major (tile_b, feat); internal compute layout is
# feature-major (feat, tile_b) so the batch sits on the 128-lane axis.
# ----------------------------------------------------------------------------
def _sigmoid(y):
    # Single EUP op (tanh); the scale/shift go to the VALU which has slack.
    return 0.5 * jnp.tanh(0.5 * y) + 0.5


def _fused_ae_kernel(x_ref,
                     w0_ref, b0_ref,   # enc0: Linear(32->16) + ReLU
                     w1_ref, b1_ref,   # enc1: Linear(16->8)  + Sigmoid
                     w2_ref, b2_ref,   # dec0: Linear(8->16)  + Sigmoid
                     w3_ref, b3_ref,   # dec1: Linear(16->32) + Sigmoid
                     lat_ref, out_ref):
    # (tile_b, DIM) -> (DIM, tile_b): in-kernel XLU transpose (idle slot).
    x = x_ref[...].astype(jnp.float32).T                             # (DIM, TILE_B)

    # Dropout(p=0.1) layers are identity in eval/inference mode.
    h = jnp.dot(w0_ref[...], x, preferred_element_type=jnp.float32) + b0_ref[...]
    h = jnp.maximum(h, 0.0)                                          # (HIDDEN, TILE_B)

    lat = jnp.dot(w1_ref[...], h, preferred_element_type=jnp.float32) + b1_ref[...]
    lat = _sigmoid(lat)                                              # (LATENT, TILE_B)

    h = jnp.dot(w2_ref[...], lat, preferred_element_type=jnp.float32) + b2_ref[...]
    h = _sigmoid(h)                                                  # (HIDDEN, TILE_B)

    out = jnp.dot(w3_ref[...], h, preferred_element_type=jnp.float32) + b3_ref[...]
    out = _sigmoid(out)                                              # (DIM, TILE_B)

    # Transpose back to batch-major before the store (outputs keep the natural
    # (B, feat) HBM layout; no wrapper transpose pass needed).
    lat_ref[...] = lat.T.astype(lat_ref.dtype)                       # (TILE_B, LATENT)
    out_ref[...] = out.T.astype(out_ref.dtype)                       # (TILE_B, DIM)


def _round_up(n, m):
    return ((n + m - 1) // m) * m


def _choose_tiling(batch, max_tile_b):
    """Pick (tile_b, padded_batch): tile_b multiple of 128, minimal padding."""
    b128 = _round_up(max(batch, 1), 128)
    if b128 <= max_tile_b:
        return b128, b128                      # single tile, pad only to 128
    m = b128 // 128
    max_t = max(1, max_tile_b // 128)
    tile_t = 1
    for t in range(max_t, 0, -1):              # largest 128-multiple dividing b128
        if m % t == 0:
            tile_t = t
            break
    if tile_t * 128 * 4 >= max_tile_b:
        return tile_t * 128, b128              # evenly divides, zero extra padding
    # Fallback for awkward (e.g. prime) batch factors: big tile, pad to a tile
    # multiple (waste < one tile; grid-step overhead would dominate otherwise).
    return max_tile_b, _round_up(batch, max_tile_b)


# ----------------------------------------------------------------------------
# Wrapper: natural (B, DIM) layout in and (B, LATENT)/(B, DIM) out.  Only pads
# the batch to lane granularity; all layout plumbing happens inside the kernel.
# ----------------------------------------------------------------------------
def autoencoder_forward(params, x, *, max_tile_b=4096, out_dtype=None):
    """Inference-mode forward pass (Dropout == identity).

    max_tile_b=4096 keeps the double-buffered per-step VMEM footprint at
    ~2.3 MiB — comfortably inside the scoped default on v5e/v6e and v7x
    (64 MiB physical).  out_dtype=jnp.bfloat16 halves output write traffic
    (sigmoid outputs in [0,1] tolerate bf16); default preserves x.dtype.
    """
    B, dim = x.shape
    assert dim == DIM
    out_dtype = x.dtype if out_dtype is None else out_dtype

    tile_b, b_pad = _choose_tiling(B, max_tile_b)
    x_in = x if b_pad == B else jnp.pad(x, ((0, b_pad - B), (0, 0)))

    w0, b0 = params["enc0"]
    w1, b1 = params["enc1"]
    w2, b2 = params["dec0"]
    w3, b3 = params["dec1"]
    # Weights stay PyTorch-style (out, in); biases reshaped to (out, 1) so they
    # broadcast over the lane (batch) axis inside the kernel.
    wb = [w0, b0.reshape(-1, 1), w1, b1.reshape(-1, 1),
          w2, b2.reshape(-1, 1), w3, b3.reshape(-1, 1)]

    const_map = lambda i: (0, 0)                       # weights resident across grid
    in_specs = [pl.BlockSpec((tile_b, DIM), lambda i: (i, 0))]
    in_specs += [pl.BlockSpec(a.shape, const_map) for a in wb]

    lat, out = pl.pallas_call(
        _fused_ae_kernel,
        out_shape=(jax.ShapeDtypeStruct((b_pad, LATENT), out_dtype),
                   jax.ShapeDtypeStruct((b_pad, DIM), out_dtype)),
        grid=(b_pad // tile_b,),
        in_specs=in_specs,
        out_specs=(pl.BlockSpec((tile_b, LATENT), lambda i: (i, 0)),
                   pl.BlockSpec((tile_b, DIM), lambda i: (i, 0))),
        compiler_params=pltpu.CompilerParams(
            dimension_semantics=("parallel",)),        # megacore on v7x, inert elsewhere
    )(x_in, *wb)

    if b_pad != B:
        lat, out = lat[:B], out[:B]
    # TODO(synk): KCOMP (KCompetitiveLayer) branch has no definition in the
    # reference source, so it is not implemented here.
    return {"x_input": x, "x_latent": lat, "x_output": out}


# ----------------------------------------------------------------------------
# Parameter init (deterministic, PyTorch-Linear-like: weight (out, in))
# ----------------------------------------------------------------------------
def init_linear(key, in_features, out_features):
    kw, kb = jax.random.split(key)
    bound = 1.0 / jnp.sqrt(in_features)
    w = jax.random.uniform(kw, (out_features, in_features), jnp.float32, -bound, bound)
    b = jax.random.uniform(kb, (out_features,), jnp.float32, -bound, bound)
    return w, b


def build_autoencoder_params(key, dim=DIM, hidden=HIDDEN, latent=LATENT):
    k = jax.random.split(key, 4)
    return {
        "enc0": init_linear(k[0], dim, hidden),     # Linear(32->16) + ReLU
        "enc1": init_linear(k[1], hidden, latent),  # Linear(16->8)  + Sigmoid
        "dec0": init_linear(k[2], latent, hidden),  # Linear(8->16)  + Sigmoid
        "dec1": init_linear(k[3], hidden, dim),     # Linear(16->32) + Sigmoid (last_isSigm)
    }


# ----------------------------------------------------------------------------
# Reference (plain JAX) for a sanity check
# ----------------------------------------------------------------------------
def reference_forward(params, x):
    def dense(x, w, b, act):
        y = x @ w.T + b
        if act == "relu":
            return jnp.maximum(y, 0.0)
        if act == "sigm":
            return jax.nn.sigmoid(y)
        return y

    h = dense(x, *params["enc0"], act="relu")
    lat = dense(h, *params["enc1"], act="sigm")
    h = dense(lat, *params["dec0"], act="sigm")
    out = dense(h, *params["dec1"], act="sigm")
    return {"x_input": x, "x_latent": lat, "x_output": out}


if __name__ == "__main__":
    key = jax.random.PRNGKey(0)
    k_params, k_x = jax.random.split(key)

    params = build_autoencoder_params(k_params, DIM, HIDDEN, LATENT)

    # Small-batch check (exercises the pad-to-128, single-tile path).
    BATCH = 2
    x = jax.random.normal(k_x, (BATCH, DIM), jnp.float32)
    out = autoencoder_forward(params, x)
    out = jax.tree_util.tree_map(jax.block_until_ready, out)
    ref = reference_forward(params, x)
    assert out["x_latent"].shape == (BATCH, LATENT)
    assert out["x_output"].shape == (BATCH, DIM)
    assert jnp.allclose(out["x_latent"], ref["x_latent"], atol=1e-4, rtol=1e-4)
    assert jnp.allclose(out["x_output"], ref["x_output"], atol=1e-4, rtol=1e-4)

    # Multi-grid-step check (forces a 3-step grid with a deliberately tiny tile).
    B2 = 300
    x2 = jax.random.normal(jax.random.PRNGKey(1), (B2, DIM), jnp.float32)
    out2 = autoencoder_forward(params, x2, max_tile_b=128)
    out2 = jax.tree_util.tree_map(jax.block_until_ready, out2)
    ref2 = reference_forward(params, x2)
    assert out2["x_output"].shape == (B2, DIM)
    assert jnp.allclose(out2["x_latent"], ref2["x_latent"], atol=1e-4, rtol=1e-4)
    assert jnp.allclose(out2["x_output"], ref2["x_output"], atol=1e-4, rtol=1e-4)

    print("KERNEL_OK")
</pallas_src>

<mosaic_0001>
module attributes {stable_mosaic.version = 11 : i64} {
  func.func @_fused_ae_kernel(%arg0: i32, %arg1: memref<128x32xf32, #tpu.memory_space<vmem>>, %arg2: memref<16x32xf32, #tpu.memory_space<vmem>>, %arg3: memref<16x1xf32, #tpu.memory_space<vmem>>, %arg4: memref<8x16xf32, #tpu.memory_space<vmem>>, %arg5: memref<8x1xf32, #tpu.memory_space<vmem>>, %arg6: memref<16x8xf32, #tpu.memory_space<vmem>>, %arg7: memref<16x1xf32, #tpu.memory_space<vmem>>, %arg8: memref<32x16xf32, #tpu.memory_space<vmem>>, %arg9: memref<32x1xf32, #tpu.memory_space<vmem>>, %arg10: memref<128x8xf32, #tpu.memory_space<vmem>>, %arg11: memref<128x32xf32, #tpu.memory_space<vmem>>) attributes {dimension_semantics = [#tpu.dimension_semantics<parallel>], iteration_bounds = array<i64: 1>, scalar_prefetch = 0 : i64, scratch_operands = 0 : i64, tpu.core_type = #tpu.core_type<tc>, window_params = [{transform_indices = @transform_0, window_bounds = array<i64: 128, 32>}, {pipeline_mode = #tpu.pipeline_mode<synchronous>, transform_indices = @transform_1, window_bounds = array<i64: 16, 32>}, {pipeline_mode = #tpu.pipeline_mode<synchronous>, transform_indices = @transform_2, window_bounds = array<i64: 16, 1>}, {pipeline_mode = #tpu.pipeline_mode<synchronous>, transform_indices = @transform_3, window_bounds = array<i64: 8, 16>}, {pipeline_mode = #tpu.pipeline_mode<synchronous>, transform_indices = @transform_4, window_bounds = array<i64: 8, 1>}, {pipeline_mode = #tpu.pipeline_mode<synchronous>, transform_indices = @transform_5, window_bounds = array<i64: 16, 8>}, {pipeline_mode = #tpu.pipeline_mode<synchronous>, transform_indices = @transform_6, window_bounds = array<i64: 16, 1>}, {pipeline_mode = #tpu.pipeline_mode<synchronous>, transform_indices = @transform_7, window_bounds = array<i64: 32, 16>}, {pipeline_mode = #tpu.pipeline_mode<synchronous>, transform_indices = @transform_8, window_bounds = array<i64: 32, 1>}, {transform_indices = @transform_9, window_bounds = array<i64: 128, 8>}, {transform_indices = @transform_10, window_bounds = array<i64: 128, 32>}]} {
    %c0 = arith.constant 0 : index
    %c0_0 = arith.constant 0 : index
    %0 = vector.load %arg1[%c0, %c0_0] : memref<128x32xf32, #tpu.memory_space<vmem>>, vector<128x32xf32>
    %1 = tpu.transpose %0, [1, 0] : vector<128x32xf32> -> vector<32x128xf32>
    %c0_1 = arith.constant 0 : index
    %c0_2 = arith.constant 0 : index
    %2 = vector.load %arg2[%c0_1, %c0_2] : memref<16x32xf32, #tpu.memory_space<vmem>>, vector<16x32xf32>
    %cst = arith.constant dense<0.000000e+00> : vector<16x128xf32>
    %3 = tpu.matmul %2, %1, %cst {dimension_numbers = #tpu.dot_dimension_numbers<[1], [0], [0], [1], [0, 0, 1, 1], [], []>} : vector<16x32xf32>, vector<32x128xf32>, vector<16x128xf32> -> vector<16x128xf32>
    %c0_3 = arith.constant 0 : index
    %c0_4 = arith.constant 0 : index
    %4 = vector.load %arg3[%c0_3, %c0_4] : memref<16x1xf32, #tpu.memory_space<vmem>>, vector<16x1xf32>
    %5 = vector.broadcast %4 : vector<16x1xf32> to vector<16x128xf32>
    %6 = arith.addf %3, %5 : vector<16x128xf32>
    %cst_5 = arith.constant 0.000000e+00 : f32
    %7 = vector.broadcast %cst_5 : f32 to vector<16x128xf32>
    %8 = arith.maximumf %6, %7 : vector<16x128xf32>
    %c0_6 = arith.constant 0 : index
    %c0_7 = arith.constant 0 : index
    %9 = vector.load %arg4[%c0_6, %c0_7] : memref<8x16xf32, #tpu.memory_space<vmem>>, vector<8x16xf32>
    %cst_8 = arith.constant dense<0.000000e+00> : vector<8x128xf32>
    %10 = tpu.matmul %9, %8, %cst_8 {dimension_numbers = #tpu.dot_dimension_numbers<[1], [0], [0], [1], [0, 0, 1, 1], [], []>} : vector<8x16xf32>, vector<16x128xf32>, vector<8x128xf32> -> vector<8x128xf32>
    %c0_9 = arith.constant 0 : index
    %c0_10 = arith.constant 0 : index
    %11 = vector.load %arg5[%c0_9, %c0_10] : memref<8x1xf32, #tpu.memory_space<vmem>>, vector<8x1xf32>
    %12 = vector.broadcast %11 : vector<8x1xf32> to vector<8x128xf32>
    %13 = arith.addf %10, %12 : vector<8x128xf32>
    %cst_11 = arith.constant 5.000000e-01 : f32
    %14 = vector.broadcast %cst_11 : f32 to vector<8x128xf32>
    %15 = arith.mulf %14, %13 : vector<8x128xf32>
    %16 = math.tanh %15 : vector<8x128xf32>
    %cst_12 = arith.constant 5.000000e-01 : f32
    %17 = vector.broadcast %cst_12 : f32 to vector<8x128xf32>
    %18 = arith.mulf %17, %16 : vector<8x128xf32>
    %cst_13 = arith.constant 5.000000e-01 : f32
    %19 = vector.broadcast %cst_13 : f32 to vector<8x128xf32>
    %20 = arith.addf %18, %19 : vector<8x128xf32>
    %c0_14 = arith.constant 0 : index
    %c0_15 = arith.constant 0 : index
    %21 = vector.load %arg6[%c0_14, %c0_15] : memref<16x8xf32, #tpu.memory_space<vmem>>, vector<16x8xf32>
    %cst_16 = arith.constant dense<0.000000e+00> : vector<16x128xf32>
    %22 = tpu.matmul %21, %20, %cst_16 {dimension_numbers = #tpu.dot_dimension_numbers<[1], [0], [0], [1], [0, 0, 1, 1], [], []>} : vector<16x8xf32>, vector<8x128xf32>, vector<16x128xf32> -> vector<16x128xf32>
    %c0_17 = arith.constant 0 : index
    %c0_18 = arith.constant 0 : index
    %23 = vector.load %arg7[%c0_17, %c0_18] : memref<16x1xf32, #tpu.memory_space<vmem>>, vector<16x1xf32>
    %24 = vector.broadcast %23 : vector<16x1xf32> to vector<16x128xf32>
    %25 = arith.addf %22, %24 : vector<16x128xf32>
    %cst_19 = arith.constant 5.000000e-01 : f32
    %26 = vector.broadcast %cst_19 : f32 to vector<16x128xf32>
    %27 = arith.mulf %26, %25 : vector<16x128xf32>
    %28 = math.tanh %27 : vector<16x128xf32>
    %cst_20 = arith.constant 5.000000e-01 : f32
    %29 = vector.broadcast %cst_20 : f32 to vector<16x128xf32>
    %30 = arith.mulf %29, %28 : vector<16x128xf32>
    %cst_21 = arith.constant 5.000000e-01 : f32
    %31 = vector.broadcast %cst_21 : f32 to vector<16x128xf32>
    %32 = arith.addf %30, %31 : vector<16x128xf32>
    %c0_22 = arith.constant 0 : index
    %c0_23 = arith.constant 0 : index
    %33 = vector.load %arg8[%c0_22, %c0_23] : memref<32x16xf32, #tpu.memory_space<vmem>>, vector<32x16xf32>
    %cst_24 = arith.constant dense<0.000000e+00> : vector<32x128xf32>
    %34 = tpu.matmul %33, %32, %cst_24 {dimension_numbers = #tpu.dot_dimension_numbers<[1], [0], [0], [1], [0, 0, 1, 1], [], []>} : vector<32x16xf32>, vector<16x128xf32>, vector<32x128xf32> -> vector<32x128xf32>
    %c0_25 = arith.constant 0 : index
    %c0_26 = arith.constant 0 : index
    %35 = vector.load %arg9[%c0_25, %c0_26] : memref<32x1xf32, #tpu.memory_space<vmem>>, vector<32x1xf32>
    %36 = vector.broadcast %35 : vector<32x1xf32> to vector<32x128xf32>
    %37 = arith.addf %34, %36 : vector<32x128xf32>
    %cst_27 = arith.constant 5.000000e-01 : f32
    %38 = vector.broadcast %cst_27 : f32 to vector<32x128xf32>
    %39 = arith.mulf %38, %37 : vector<32x128xf32>
    %40 = math.tanh %39 : vector<32x128xf32>
    %cst_28 = arith.constant 5.000000e-01 : f32
    %41 = vector.broadcast %cst_28 : f32 to vector<32x128xf32>
    %42 = arith.mulf %41, %40 : vector<32x128xf32>
    %cst_29 = arith.constant 5.000000e-01 : f32
    %43 = vector.broadcast %cst_29 : f32 to vector<32x128xf32>
    %44 = arith.addf %42, %43 : vector<32x128xf32>
    %45 = tpu.transpose %20, [1, 0] : vector<8x128xf32> -> vector<128x8xf32>
    %c0_30 = arith.constant 0 : index
    %c0_31 = arith.constant 0 : index
    %46 = vector.load %arg10[%c0_30, %c0_31] : memref<128x8xf32, #tpu.memory_space<vmem>>, vector<128x8xf32>
    tpu.vector_store %arg10[%c0_30, %c0_31], %45 {strides = array<i32>} : memref<128x8xf32, #tpu.memory_space<vmem>>, vector<128x8xf32>,
    %47 = tpu.transpose %44, [1, 0] : vector<32x128xf32> -> vector<128x32xf32>
    %c0_32 = arith.constant 0 : index
    %c0_33 = arith.constant 0 : index
    %48 = vector.load %arg11[%c0_32, %c0_33] : memref<128x32xf32, #tpu.memory_space<vmem>>, vector<128x32xf32>
    tpu.vector_store %arg11[%c0_32, %c0_33], %47 {strides = array<i32>} : memref<128x32xf32, #tpu.memory_space<vmem>>, vector<128x32xf32>,
    return
  }
  func.func @transform_0(%arg0: i32) -> (i32, i32) {
    %c0_i32 = arith.constant 0 : i32
    %c0_i32_0 = arith.constant 0 : i32
    return %arg0, %c0_i32 : i32, i32
  }
  func.func @transform_1(%arg0: i32) -> (i32, i32) {
    %c0_i32 = arith.constant 0 : i32
    %c0_i32_0 = arith.constant 0 : i32
    %c0_i32_1 = arith.constant 0 : i32
    return %c0_i32, %c0_i32_0 : i32, i32
  }
  func.func @transform_2(%arg0: i32) -> (i32, i32) {
    %c0_i32 = arith.constant 0 : i32
    %c0_i32_0 = arith.constant 0 : i32
    %c0_i32_1 = arith.constant 0 : i32
    return %c0_i32, %c0_i32_0 : i32, i32
  }
  func.func @transform_3(%arg0: i32) -> (i32, i32) {
    %c0_i32 = arith.constant 0 : i32
    %c0_i32_0 = arith.constant 0 : i32
    %c0_i32_1 = arith.constant 0 : i32
    return %c0_i32, %c0_i32_0 : i32, i32
  }
  func.func @transform_4(%arg0: i32) -> (i32, i32) {
    %c0_i32 = arith.constant 0 : i32
    %c0_i32_0 = arith.constant 0 : i32
    %c0_i32_1 = arith.constant 0 : i32
    return %c0_i32, %c0_i32_0 : i32, i32
  }
  func.func @transform_5(%arg0: i32) -> (i32, i32) {
    %c0_i32 = arith.constant 0 : i32
    %c0_i32_0 = arith.constant 0 : i32
    %c0_i32_1 = arith.constant 0 : i32
    return %c0_i32, %c0_i32_0 : i32, i32
  }
  func.func @transform_6(%arg0: i32) -> (i32, i32) {
    %c0_i32 = arith.constant 0 : i32
    %c0_i32_0 = arith.constant 0 : i32
    %c0_i32_1 = arith.constant 0 : i32
    return %c0_i32, %c0_i32_0 : i32, i32
  }
  func.func @transform_7(%arg0: i32) -> (i32, i32) {
    %c0_i32 = arith.constant 0 : i32
    %c0_i32_0 = arith.constant 0 : i32
    %c0_i32_1 = arith.constant 0 : i32
    return %c0_i32, %c0_i32_0 : i32, i32
  }
  func.func @transform_8(%arg0: i32) -> (i32, i32) {
    %c0_i32 = arith.constant 0 : i32
    %c0_i32_0 = arith.constant 0 : i32
    %c0_i32_1 = arith.constant 0 : i32
    return %c0_i32, %c0_i32_0 : i32, i32
  }
  func.func @transform_9(%arg0: i32) -> (i32, i32) {
    %c0_i32 = arith.constant 0 : i32
    %c0_i32_0 = arith.constant 0 : i32
    return %arg0, %c0_i32 : i32, i32
  }
  func.func @transform_10(%arg0: i32) -> (i32, i32) {
    %c0_i32 = arith.constant 0 : i32
    %c0_i32_0 = arith.constant 0 : i32
    return %arg0, %c0_i32 : i32, i32
  }
}

</mosaic_0001>

<bundles_post_ra>
// kernel: tpu_custom_call.1
= control target key start
LH: loop header
LB: loop body
LE: loop exit
PB: predicated region body
PF: predicated region fallthrough
CT: control target
= control target key end

     0   :  { %vm64_vm0 = vcmask 261120   ;;  %v761_v2 = vmov 0   ;;  %v762_v24 = vmov 0.0   ;;  %vm763_vm1 = vmmov 0   ;;  %s1090_s0 = inlined_call_operand.vmem [shape: f32[128,32], index: 0, kind: input, shape index: {}]   ;;  %s1091_s1 = inlined_call_operand.vmem [shape: f32[16,32], index: 1, kind: input, shape index: {}]   ;;  %s1092_s2 = inlined_call_operand.vmem [shape: f32[16,1], index: 2, kind: input, shape index: {}]   ;;  %s1093_s6 = inlined_call_operand.vmem [shape: f32[16,1], index: 6, kind: input, shape index: {}]   ;;  %s1094_s8 = inlined_call_operand.vmem [shape: f32[32,1], index: 8, kind: input, shape index: {}]   ;;  %s1095_s4 = inlined_call_operand.vmem [shape: f32[8,1], index: 4, kind: input, shape index: {}]   ;;  %s1096_s3 = inlined_call_operand.vmem [shape: f32[8,16], index: 3, kind: input, shape index: {}]   ;;  %s1097_s5 = inlined_call_operand.vmem [shape: f32[16,8], index: 5, kind: input, shape index: {}]   ;;  %s1098_s7 = inlined_call_operand.vmem [shape: f32[32,16], index: 7, kind: input, shape index: {}]   ;;  %s1099_s9 = inlined_call_operand.vmem [shape: f32[128,8], index: 9, kind: output, shape index: {0}]   ;;  %s1100_s10 = inlined_call_operand.vmem [shape: f32[128,32], index: 10, kind: output, shape index: {1}]  }
   0x1   :  { %v49_v0 = vld [vmem:[%s1090_s0 + $0x78] sm:$0xff]  ;;  %v48_v1 = vld [vmem:[%s1090_s0 + $0x70] sm:$0xff]  ;;  %745 = vset.pattern.permute.xlu0 %v761_v2  ;;  %746 = vset.pattern.permute.xlu1 %v761_v2  ;;  %v47_v3 = vld [vmem:[%s1090_s0 + $0x68] sm:$0xff]  ;;  %vm203_vm2 = vcmask 130048   ;;  %vm295_vm3 = vcmask 64512  }
   0x2   :  { %685 = vmatprep.subr.msk.mxu0 %vm64_vm0, %v49_v0  ;;  %v50_v4 = vld [vmem:[%s1091_s1] sm:$0xff]  ;;  %v53_v5 = vld [vmem:[%s1092_s2 + $0x8] sm:$0xff]  ;;  %v45_v8 = vld [vmem:[%s1090_s0 + $0x58] sm:$0xff]  ;;  %720 = vmatprep.subr.mxu1 %v762_v24 }
   0x3   :  { %686 = vmatpush3.xpose.msk.msra.mxu0 %vm64_vm0, %v49_v0  ;;  %717 = vmatprep.mubr.msk.f32.mxu0 %vm64_vm0, %v50_v4  ;;  %v46_v6 = vld [vmem:[%s1090_s0 + $0x60] sm:$0xff]  ;;  %v44_v10 = vld [vmem:[%s1090_s0 + $0x50] sm:$0xff]  ;;  %v390_v11 = vld [vmem:[%s1094_s8 + $0x8] sm:$0xff] }
   0x4   :  { %687 = vmatprep.subr.msk.mxu0 %vm64_vm0, %v48_v1  ;;  %61 = vperm.xlu0 %745, %v53_v5   ;;  %v52_v7 = vld [vmem:[%s1092_s2] sm:$0xff]  ;;  %v43_v12 = vld [vmem:[%s1090_s0 + $0x48] sm:$0xff]  ;;  %v392_v13 = vld [vmem:[%s1094_s8 + $0x18] sm:$0xff] }
   0x5   :  { %v283_v9 = vld [vmem:[%s1093_s6] sm:$0xff]  ;;  %v41_v15 = vld [vmem:[%s1090_s0 + $0x38] sm:$0xff]  ;;  %v40_v16 = vld [vmem:[%s1090_s0 + $0x30] sm:$0xff]  ;;  %724 = vmatprep.mubr.msk.f32.mxu1 %vm763_vm1, %v762_v24 }
   0x6   :  { %v42_v14 = vld [vmem:[%s1090_s0 + $0x40] sm:$0xff]  ;;  %v39_v17 = vld [vmem:[%s1090_s0 + $0x28] sm:$0xff]  ;;  %v37_v19 = vld [vmem:[%s1090_s0 + $0x18] sm:$0xff] }
   0x7   :  { %688 = vmatpush3.xpose.msk.msra.mxu0 %vm64_vm0, %v48_v1  ;;  %v38_v18 = vld [vmem:[%s1090_s0 + $0x20] sm:$0xff]  ;;  %v36_v20 = vld [vmem:[%s1090_s0 + $0x10] sm:$0xff]  ;;  %v35_v21 = vld [vmem:[%s1090_s0 + $0x8] sm:$0xff] }
   0x8   :  { %689 = vmatprep.subr.msk.mxu0 %vm64_vm0, %v47_v3  ;;  %56 = vperm.xlu0 %745, %v52_v7   ;;  %v34_v22 = vld [vmem:[%s1090_s0] sm:$0xff]  ;;  %v51_v23 = vld [vmem:[%s1091_s1 + $0x8] sm:$0xff]  ;;  %v391_v28 = vld [vmem:[%s1094_s8 + $0x10] sm:$0xff] }
   0x9   :  { %v197_v25 = vld [vmem:[%s1095_s4] sm:$0xff]  ;;  %v284_v26 = vld [vmem:[%s1093_s6 + $0x8] sm:$0xff]  ;;  %v387_v0 = vld [vmem:[%s1098_s7 + $0x10] sm:$0xff] }
   0xa   :  { %200 = vperm.xlu1 %746, %v197_v25   ;;  %v389_v27 = vld [vmem:[%s1094_s8] sm:$0xff]  ;;  %v282_v47 = vld [vmem:[%s1097_s5 + $0x8] sm:$0xff]  ;;  %v388_v1 = vld [vmem:[%s1098_s7 + $0x18] sm:$0xff] }
   0xb   :  { %690 = vmatpush3.xpose.msk.msra.mxu0 %vm64_vm0, %v47_v3  ;;  %v196_v37 = vld [vmem:[%s1096_s3] sm:$0xff]  ;;  %v386_v63 = vld [vmem:[%s1098_s7 + $0x8] sm:$0xff] }
   0xc   :  { %691 = vmatprep.subr.msk.mxu0 %vm64_vm0, %v46_v6  ;;  %287 = vperm.xlu0 %745, %v283_v9   ;;  %v281_v38 = vld [vmem:[%s1097_s5] sm:$0xff] }
   0xd   :  { %v385_v48 = vld [vmem:[%s1098_s7] sm:$0xff] }
   0xe   :  { %292 = vperm.xlu1 %746, %v284_v26  }
   0xf   :  { %692 = vmatpush3.xpose.msk.msra.mxu0 %vm64_vm0, %v46_v6 }
  0x10   :  { %693 = vmatprep.subr.msk.mxu0 %vm64_vm0, %v45_v8  ;;  %400 = vperm.xlu0 %745, %v390_v11  }
  0x12   :  { %395 = vperm.xlu1 %746, %v389_v27  }
  0x13   :  { %694 = vmatpush3.xpose.msk.msra.mxu0 %vm64_vm0, %v45_v8 }
  0x14   :  { %695 = vmatprep.subr.msk.mxu0 %vm64_vm0, %v44_v10  ;;  %410 = vperm.xlu0 %745, %v392_v13  }
  0x16   :  { %405 = vperm.xlu1 %746, %v391_v28  }
  0x17   :  { %696 = vmatpush3.xpose.msk.msra.mxu0 %vm64_vm0, %v44_v10 }
  0x18   :  { %697 = vmatprep.subr.msk.mxu0 %vm64_vm0, %v43_v12 }
  0x1b   :  { %698 = vmatpush3.xpose.msk.msra.mxu0 %vm64_vm0, %v43_v12 }
  0x1c   :  { %699 = vmatprep.subr.msk.mxu0 %vm64_vm0, %v42_v14 }
  0x1f   :  { %700 = vmatpush3.xpose.msk.msra.mxu0 %vm64_vm0, %v42_v14 }
  0x20   :  { %701 = vmatprep.subr.msk.mxu0 %vm64_vm0, %v41_v15 }
  0x23   :  { %702 = vmatpush3.xpose.msk.msra.mxu0 %vm64_vm0, %v41_v15 }
  0x24   :  { %703 = vmatprep.subr.msk.mxu0 %vm64_vm0, %v40_v16 }
  0x27   :  { %704 = vmatpush3.xpose.msk.msra.mxu0 %vm64_vm0, %v40_v16 }
  0x28   :  { %705 = vmatprep.subr.msk.mxu0 %vm64_vm0, %v39_v17 }
  0x2b   :  { %706 = vmatpush3.xpose.msk.msra.mxu0 %vm64_vm0, %v39_v17 }
  0x2c   :  { %707 = vmatprep.subr.msk.mxu0 %vm64_vm0, %v38_v18 }
  0x2f   :  { %708 = vmatpush3.xpose.msk.msra.mxu0 %vm64_vm0, %v38_v18 }
  0x30   :  { %709 = vmatprep.subr.msk.mxu0 %vm64_vm0, %v37_v19 }
  0x33   :  { %710 = vmatpush3.xpose.msk.msra.mxu0 %vm64_vm0, %v37_v19 }
  0x34   :  { %711 = vmatprep.subr.msk.mxu0 %vm64_vm0, %v36_v20 }
  0x37   :  { %712 = vmatpush3.xpose.msk.msra.mxu0 %vm64_vm0, %v36_v20 }
  0x38   :  { %713 = vmatprep.subr.msk.mxu0 %vm64_vm0, %v35_v21 }
  0x3b   :  { %714 = vmatpush3.xpose.msk.msra.mxu0 %vm64_vm0, %v35_v21 }
  0x3c   :  { %715 = vmatprep.subr.msk.mxu0 %vm64_vm0, %v34_v22 }
  0x3f   :  { %716 = vmatpush3.xpose.msk.msra.mxu0 %vm64_vm0, %v34_v22 }
  0x42   :  { %718 = vmatmul.mubr.msk.f32.vlgmr.msra.gmra.mxu0 %vm64_vm0, %v51_v23 }
  0x7f   :  { %v62_v29 = vpop.permute.xlu0 %61 }
  0x83   :  { %v57_v32 = vpop.permute.xlu0 %56 }
  0x85   :  { %v201_v39 = vpop.permute.xlu1 %200 }
  0x87   :  { %v288_v52 = vpop.permute.xlu0 %287 }
  0x89   :  { %v293_v49 = vpop.permute.xlu1 %292 }
  0x8b   :  { %v401_v5 = vpop.permute.xlu0 %400 }
  0x8d   :  { %v396_v2 = vpop.permute.xlu1 %395 }
  0x8f   :  { %v411_v13 = vpop.permute.xlu0 %410 }
  0x91   :  { %v406_v3 = vpop.permute.xlu1 %405 }
 0x102   :  { %v719_v30 = vpop.f32.mrf.mxu0 }
 0x103   :  { %v191_v31 = vadd.f32 %v719_v30, %v62_v29 }
 0x104   :  { %v185_v33 = vpop.f32.mrf.mxu0 }
 0x105   :  { %v195_v34 = vmax.f32 %v191_v31, 0.0  ;;  %v186_v35 = vadd.f32 %v185_v33, %v57_v32 }
 0x107   :  { %v194_v36 = vmax.f32 %v186_v35, 0.0  ;;  %721 = vmatpush3.msra.mxu1 %v195_v34 }
 0x108   :  { %722 = vmatprep.subr.mxu1 %v762_v24 }
 0x109   :  { %723 = vmatpush3.msra.mxu1 %v194_v36 }
 0x10a   :  { %725 = vmatmul.mubr.msk.f32.vlgmr.msra.gmra.mxu1 %vm203_vm2, %v196_v37 }
 0x10b   :  { %729 = vmatprep.mubr.msk.f32.mxu1 %vm295_vm3, %v281_v38 }
 0x1ca   :  { %v273_v40 = vpop.f32.mrf.mxu1 }
 0x1cb   :  { %v274_v41 = vadd.f32 %v273_v40, %v201_v39 }
 0x1cc   :  { %v726_v42 = vpop.f32.mrf.mxu1 }
 0x1cd   :  { %v277_v43 = vmul.f32 0.5, %v274_v41 }
 0x1cf   :  { %747 = vtanh.f32 %v277_v43 }
 0x1dc   :  { %v748_v44 = vpop.eup %747 }
 0x1dd   :  { %v279_v45 = vmul.f32 0.5, %v748_v44 }
 0x1df   :  { %v280_v46 = vadd.f32 0.5, %v279_v45 }
 0x1e1   :  { %526 = vxpose.xlu1.b32.start.end [1/1] (short) %v280_v46, 128  ;;  %727 = vmatprep.subr.mxu1 %v280_v46 }
 0x1e2   :  { %728 = vmatpush3.msra.mxu1 %v280_v46 }
 0x1e3   :  { %730 = vmatmul.mubr.msk.f32.vlgmr.msra.gmra.mxu1 %vm295_vm3, %v282_v47 }
 0x1e4   :  { %736 = vmatprep.mubr.msk.f32.mxu1 %vm203_vm2, %v385_v48 }
 0x25d   :  { %v542_v4 = vpop.trf.xlu1 }
 0x25e   :  { %558 = vst.msk [vmem:[%s1099_s9] sm:$0xff] %vm295_vm3, %v542_v4 }
 0x261   :  { %v543_v22 = vpop.trf.xlu1 }
 0x262   :  { %559 = vst.msk [vmem:[%s1099_s9 + $0x8] sm:$0xff] %vm295_vm3, %v543_v22 }
 0x265   :  { %v544_v26 = vpop.trf.xlu1 }
 0x266   :  { %560 = vst.msk [vmem:[%s1099_s9 + $0x10] sm:$0xff] %vm295_vm3, %v544_v26 }
 0x269   :  { %v545_v30 = vpop.trf.xlu1 }
 0x26a   :  { %561 = vst.msk [vmem:[%s1099_s9 + $0x18] sm:$0xff] %vm295_vm3, %v545_v30 }
 0x26d   :  { %v546_v33 = vpop.trf.xlu1 }
 0x26e   :  { %562 = vst.msk [vmem:[%s1099_s9 + $0x20] sm:$0xff] %vm295_vm3, %v546_v33 }
 0x271   :  { %v547_v35 = vpop.trf.xlu1 }
 0x272   :  { %563 = vst.msk [vmem:[%s1099_s9 + $0x28] sm:$0xff] %vm295_vm3, %v547_v35 }
 0x275   :  { %v548_v36 = vpop.trf.xlu1 }
 0x276   :  { %564 = vst.msk [vmem:[%s1099_s9 + $0x30] sm:$0xff] %vm295_vm3, %v548_v36 }
 0x279   :  { %v549_v37 = vpop.trf.xlu1 }
 0x27a   :  { %565 = vst.msk [vmem:[%s1099_s9 + $0x38] sm:$0xff] %vm295_vm3, %v549_v37 }
 0x27d   :  { %v550_v38 = vpop.trf.xlu1 }
 0x27e   :  { %566 = vst.msk [vmem:[%s1099_s9 + $0x40] sm:$0xff] %vm295_vm3, %v550_v38 }
 0x281   :  { %v551_v39 = vpop.trf.xlu1 }
 0x282   :  { %567 = vst.msk [vmem:[%s1099_s9 + $0x48] sm:$0xff] %vm295_vm3, %v551_v39 }
 0x285   :  { %v552_v40 = vpop.trf.xlu1 }
 0x286   :  { %568 = vst.msk [vmem:[%s1099_s9 + $0x50] sm:$0xff] %vm295_vm3, %v552_v40 }
 0x289   :  { %v553_v41 = vpop.trf.xlu1 }
 0x28a   :  { %569 = vst.msk [vmem:[%s1099_s9 + $0x58] sm:$0xff] %vm295_vm3, %v553_v41 }
 0x28d   :  { %v554_v42 = vpop.trf.xlu1 }
 0x28e   :  { %570 = vst.msk [vmem:[%s1099_s9 + $0x60] sm:$0xff] %vm295_vm3, %v554_v42 }
 0x291   :  { %v555_v43 = vpop.trf.xlu1 }
 0x292   :  { %571 = vst.msk [vmem:[%s1099_s9 + $0x68] sm:$0xff] %vm295_vm3, %v555_v43 }
 0x295   :  { %v556_v44 = vpop.trf.xlu1 }
 0x296   :  { %572 = vst.msk [vmem:[%s1099_s9 + $0x70] sm:$0xff] %vm295_vm3, %v556_v44 }
 0x299   :  { %v557_v45 = vpop.trf.xlu1 }
 0x29a   :  { %573 = vst.msk [vmem:[%s1099_s9 + $0x78] sm:$0xff] %vm295_vm3, %v557_v45 }
 0x2a3   :  { %v731_v50 = vpop.f32.mrf.mxu1 }
 0x2a4   :  { %v374_v51 = vadd.f32 %v731_v50, %v293_v49 }
 0x2a5   :  { %v368_v53 = vpop.f32.mrf.mxu1 }
 0x2a6   :  { %v378_v54 = vmul.f32 0.5, %v374_v51  ;;  %v369_v55 = vadd.f32 %v368_v53, %v288_v52 }
 0x2a8   :  { %749 = vtanh.f32 %v378_v54  ;;  %v377_v56 = vmul.f32 0.5, %v369_v55 }
 0x2aa   :  { %751 = vtanh.f32 %v377_v56 }
 0x2b5   :  { %v750_v57 = vpop.eup %749 }
 0x2b6   :  { %v382_v58 = vmul.f32 0.5, %v750_v57 }
 0x2b7   :  { %v752_v59 = vpop.eup %751 }
 0x2b8   :  { %v384_v60 = vadd.f32 0.5, %v382_v58  ;;  %v381_v61 = vmul.f32 0.5, %v752_v59 }
 0x2ba   :  { %732 = vmatprep.subr.mxu1 %v384_v60  ;;  %v383_v62 = vadd.f32 0.5, %v381_v61 }
 0x2bb   :  { %733 = vmatpush3.msra.mxu1 %v384_v60 }
 0x2bc   :  { %734 = vmatprep.subr.mxu1 %v383_v62 }
 0x2bd   :  { %735 = vmatpush3.msra.mxu1 %v383_v62 }
 0x2be   :  { %737 = vmatmul.mubr.msk.f32.vlgmr.msra.gmra.mxu1 %vm203_vm2, %v386_v63 }
 0x2bf   :  { %739 = vmatprep.mubr.msk.f32.mxu1 %vm203_vm2, %v387_v0 }
 0x2c2   :  { %740 = vmatmul.mubr.msk.f32.gmra.mxu1 %vm203_vm2, %v388_v1 }
 0x37e   :  { %v738_v6 = vpop.f32.mrf.mxu1 }
 0x37f   :  { %v497_v7 = vadd.f32 %v738_v6, %v401_v5 }
 0x380   :  { %v491_v8 = vpop.f32.mrf.mxu1 }
 0x381   :  { %v511_v9 = vmul.f32 0.5, %v497_v7  ;;  %v492_v10 = vadd.f32 %v491_v8, %v396_v2 }
 0x382   :  { %v741_v11 = vpop.f32.mrf.mxu1 }
 0x383   :  { %v510_v12 = vmul.f32 0.5, %v492_v10  ;;  %753 = vtanh.f32 %v511_v9  ;;  %v507_v15 = vadd.f32 %v741_v11, %v411_v13 }
 0x384   :  { %v501_v14 = vpop.f32.mrf.mxu1 }
 0x385   :  { %755 = vtanh.f32 %v510_v12  ;;  %v502_v16 = vadd.f32 %v501_v14, %v406_v3  ;;  %v513_v18 = vmul.f32 0.5, %v507_v15 }
 0x387   :  { %v512_v17 = vmul.f32 0.5, %v502_v16 }
 0x389   :  { %757 = vtanh.f32 %v512_v17 }
 0x38a   :  { %759 = vtanh.f32 %v513_v18 }
 0x390   :  { %v754_v19 = vpop.eup %753 }
 0x391   :  { %v519_v23 = vmul.f32 0.5, %v754_v19 }
 0x392   :  { %v756_v20 = vpop.eup %755 }
 0x393   :  { %v518_v21 = vmul.f32 0.5, %v756_v20  ;;  %v523_v27 = vadd.f32 0.5, %v519_v23 }
 0x395   :  { %v522_v24 = vadd.f32 0.5, %v518_v21 }
 0x396   :  { %v758_v25 = vpop.eup %757 }
 0x397   :  { %574 = vxpose.xlu0.b32.start [1/4] (short) %v522_v24, 128  ;;  %v520_v28 = vmul.f32 0.5, %v758_v25  ;;  %v760_v29 = vpop.eup %759 }
 0x398   :  { %v521_v31 = vmul.f32 0.5, %v760_v29 }
 0x399   :  { %v524_v32 = vadd.f32 0.5, %v520_v28 }
 0x39a   :  { %v525_v34 = vadd.f32 0.5, %v521_v31 }
 0x39b   :  { %575 = vxpose.xlu0.b32.cont [2/4] (short) %v523_v27, 128 }
 0x39f   :  { %576 = vxpose.xlu0.b32.cont [3/4] (short) %v524_v32, 128 }
 0x3a3   :  { %577 = vxpose.xlu0.b32.end [4/4] (short) %v525_v34, 128 }
 0x413   :  { %v590_v46 = vpop.trf.xlu0 }
 0x414   :  { %606 = vst.msk [vmem:[%s1100_s10] sm:$0xff] %vm64_vm0, %v590_v46 }
 0x417   :  { %v591_v47 = vpop.trf.xlu0 }
 0x418   :  { %607 = vst.msk [vmem:[%s1100_s10 + $0x8] sm:$0xff] %vm64_vm0, %v591_v47 }
 0x41b   :  { %v592_v48 = vpop.trf.xlu0 }
 0x41c   :  { %608 = vst.msk [vmem:[%s1100_s10 + $0x10] sm:$0xff] %vm64_vm0, %v592_v48 }
 0x41f   :  { %v593_v49 = vpop.trf.xlu0 }
 0x420   :  { %609 = vst.msk [vmem:[%s1100_s10 + $0x18] sm:$0xff] %vm64_vm0, %v593_v49 }
 0x423   :  { %v594_v50 = vpop.trf.xlu0 }
 0x424   :  { %610 = vst.msk [vmem:[%s1100_s10 + $0x20] sm:$0xff] %vm64_vm0, %v594_v50 }
 0x427   :  { %v595_v51 = vpop.trf.xlu0 }
 0x428   :  { %611 = vst.msk [vmem:[%s1100_s10 + $0x28] sm:$0xff] %vm64_vm0, %v595_v51 }
 0x42b   :  { %v596_v52 = vpop.trf.xlu0 }
 0x42c   :  { %612 = vst.msk [vmem:[%s1100_s10 + $0x30] sm:$0xff] %vm64_vm0, %v596_v52 }
 0x42f   :  { %v597_v53 = vpop.trf.xlu0 }
 0x430   :  { %613 = vst.msk [vmem:[%s1100_s10 + $0x38] sm:$0xff] %vm64_vm0, %v597_v53 }
 0x433   :  { %v598_v54 = vpop.trf.xlu0 }
 0x434   :  { %614 = vst.msk [vmem:[%s1100_s10 + $0x40] sm:$0xff] %vm64_vm0, %v598_v54 }
 0x437   :  { %v599_v55 = vpop.trf.xlu0 }
 0x438   :  { %615 = vst.msk [vmem:[%s1100_s10 + $0x48] sm:$0xff] %vm64_vm0, %v599_v55 }
 0x43b   :  { %v600_v56 = vpop.trf.xlu0 }
 0x43c   :  { %616 = vst.msk [vmem:[%s1100_s10 + $0x50] sm:$0xff] %vm64_vm0, %v600_v56 }
 0x43f   :  { %v601_v57 = vpop.trf.xlu0 }
 0x440   :  { %617 = vst.msk [vmem:[%s1100_s10 + $0x58] sm:$0xff] %vm64_vm0, %v601_v57 }
 0x443   :  { %v602_v58 = vpop.trf.xlu0 }
 0x444   :  { %618 = vst.msk [vmem:[%s1100_s10 + $0x60] sm:$0xff] %vm64_vm0, %v602_v58 }
 0x447   :  { %v603_v59 = vpop.trf.xlu0 }
 0x448   :  { %619 = vst.msk [vmem:[%s1100_s10 + $0x68] sm:$0xff] %vm64_vm0, %v603_v59 }
 0x44b   :  { %v604_v60 = vpop.trf.xlu0 }
 0x44c   :  { %620 = vst.msk [vmem:[%s1100_s10 + $0x70] sm:$0xff] %vm64_vm0, %v604_v60 }
 0x44f   :  { %v605_v61 = vpop.trf.xlu0 }
 0x450   :  { %621 = vst.msk [vmem:[%s1100_s10 + $0x78] sm:$0xff] %vm64_vm0, %v605_v61 }

</bundles_post_ra>
